<compile_context>
chip_gen: v6e
topology: v6e:2x2x1
jax: 0.10.0
libtpu: 0.0.40
codegen_flags: <defaults>
</compile_context>

<pallas_src>
import jax
import jax.numpy as jnp
from jax.experimental import pallas as pl
from jax.experimental.pallas import tpu as pltpu


def mlp_kernel(x_ref, w1_ref, b1_ref, w2_ref, b2_ref, w3_ref, b3_ref, o_ref):
    # Fused: Linear -> ReLU -> Dropout(eval) -> Linear -> ReLU -> Dropout(eval)
    #        -> Linear.  bf16 x bf16 -> f32 accumulation on the MXU.
    x = x_ref[...].astype(jnp.bfloat16)

    h1 = jnp.dot(x, w1_ref[...].astype(jnp.bfloat16),
                 preferred_element_type=jnp.float32) + b1_ref[...]
    h1 = jnp.maximum(h1, 0.0).astype(jnp.bfloat16)
    # TODO(synk): training-mode dropout (p=0.3) not implemented; eval semantics (identity) used.

    h2 = jnp.dot(h1, w2_ref[...].astype(jnp.bfloat16),
                 preferred_element_type=jnp.float32) + b2_ref[...]
    h2 = jnp.maximum(h2, 0.0).astype(jnp.bfloat16)

    out = jnp.dot(h2, w3_ref[...].astype(jnp.bfloat16),
                  preferred_element_type=jnp.float32) + b3_ref[...]
    # Single full-tile, lane-dense (multiple-of-128 columns) unmasked store.
    o_ref[...] = out.astype(o_ref.dtype)


def isotype_predictor_mlp(x, params, *, max_tb=128, lane=128):
    """Runs the fused MLP. Returns (B, num_classes) f32."""
    w1, b1, w2, b2, w3, b3 = params
    B, D_in = x.shape
    H1 = w1.shape[1]
    H2 = w2.shape[1]
    C = w3.shape[1]

    # Batch tile: multiple of 8 sublanes, capped at max_tb; pad the batch up
    # to a tile multiple (padded rows are junk and sliced off below).
    tb = min(max_tb, 8 * pl.cdiv(B, 8))
    B_pad = tb * pl.cdiv(B, tb)
    if B_pad != B:
        x = jnp.pad(x, ((0, B_pad - B), (0, 0)))

    # Lane-dense output: pad the final layer's output columns to a multiple of
    # 128 so the store is a full-width unmasked vst. Extra columns sliced off.
    C_pad = lane * pl.cdiv(C, lane)
    if C_pad != C:
        w3 = jnp.pad(w3, ((0, 0), (0, C_pad - C)))
        b3 = jnp.pad(b3, ((0, 0), (0, C_pad - C)))

    # Everything is shipped to VMEM as f32; bf16 casts happen in-kernel.
    x = x.astype(jnp.float32)
    w1 = w1.astype(jnp.float32)
    w2 = w2.astype(jnp.float32)
    w3 = w3.astype(jnp.float32)
    b1 = b1.astype(jnp.float32)
    b2 = b2.astype(jnp.float32)
    b3 = b3.astype(jnp.float32)

    full = lambda shape: pl.BlockSpec(shape, lambda i: (0, 0))
    grid_spec = pltpu.PrefetchScalarGridSpec(
        num_scalar_prefetch=0,
        grid=(B_pad // tb,),
        in_specs=[
            pl.BlockSpec((tb, D_in), lambda i: (i, 0)),
            full((D_in, H1)),
            full((1, H1)),
            full((H1, H2)),
            full((1, H2)),
            full((H2, C_pad)),
            full((1, C_pad)),
        ],
        out_specs=pl.BlockSpec((tb, C_pad), lambda i: (i, 0)),
    )

    flops = 2 * B_pad * (D_in * H1 + H1 * H2 + H2 * C_pad)
    bytes_accessed = (
        x.size * 4
        + (w1.size + w2.size + w3.size) * 4
        + (b1.size + b2.size + b3.size) * 4
        + B_pad * C_pad * 4
    )

    out = pl.pallas_call(
        mlp_kernel,
        out_shape=jax.ShapeDtypeStruct((B_pad, C_pad), jnp.float32),
        grid_spec=grid_spec,
        compiler_params=pltpu.CompilerParams(
            dimension_semantics=("parallel",)),
        cost_estimate=pl.CostEstimate(
            flops=flops, transcendentals=0, bytes_accessed=bytes_accessed),
    )(x, w1, b1, w2, b2, w3, b3)

    return out[:B, :C]


def init_params(key, input_dim, hidden_dim1, hidden_dim2, num_classes):
    # Deterministic synthetic init (PyTorch-Linear-like uniform bounds).
    ks = jax.random.split(key, 6)

    def linear(kw, kb, fan_in, fan_out):
        bound = 1.0 / jnp.sqrt(fan_in)
        w = jax.random.uniform(kw, (fan_in, fan_out), jnp.float32, -bound, bound)
        b = jax.random.uniform(kb, (1, fan_out), jnp.float32, -bound, bound)
        return w, b

    w1, b1 = linear(ks[0], ks[1], input_dim, hidden_dim1)
    w2, b2 = linear(ks[2], ks[3], hidden_dim1, hidden_dim2)
    w3, b3 = linear(ks[4], ks[5], hidden_dim2, num_classes)
    return (w1, b1, w2, b2, w3, b3)


def reference(x, params):
    # Emulates the kernel's numerics: bf16 MXU operands, f32 accumulation.
    w1, b1, w2, b2, w3, b3 = params
    bf = lambda a: a.astype(jnp.bfloat16)
    h1 = jnp.maximum(
        jnp.dot(bf(x), bf(w1), preferred_element_type=jnp.float32) + b1, 0.0)
    h2 = jnp.maximum(
        jnp.dot(bf(h1), bf(w2), preferred_element_type=jnp.float32) + b2, 0.0)
    return jnp.dot(bf(h2), bf(w3), preferred_element_type=jnp.float32) + b3


if __name__ == "__main__":
    key = jax.random.PRNGKey(0)
    kx, kp = jax.random.split(key)

    batch = 16
    input_dim = 32
    hidden_dim1 = 64
    hidden_dim2 = 32
    num_classes = 8

    x = jax.random.normal(kx, (batch, input_dim), jnp.float32)
    params = init_params(kp, input_dim, hidden_dim1, hidden_dim2, num_classes)

    out = isotype_predictor_mlp(x, params)
    out = jax.block_until_ready(out)

    ref = reference(x, params)
    assert out.shape == (batch, num_classes)
    assert jnp.allclose(out, ref, atol=1e-2, rtol=1e-2), "mismatch vs reference"

    print("KERNEL_OK")
</pallas_src>

<mosaic_0001>
module attributes {stable_mosaic.version = 11 : i64} {
  func.func @mlp_kernel(%arg0: i32, %arg1: memref<16x32xf32, #tpu.memory_space<vmem>>, %arg2: memref<32x64xf32, #tpu.memory_space<vmem>>, %arg3: memref<1x64xf32, #tpu.memory_space<vmem>>, %arg4: memref<64x32xf32, #tpu.memory_space<vmem>>, %arg5: memref<1x32xf32, #tpu.memory_space<vmem>>, %arg6: memref<32x128xf32, #tpu.memory_space<vmem>>, %arg7: memref<1x128xf32, #tpu.memory_space<vmem>>, %arg8: memref<16x128xf32, #tpu.memory_space<vmem>>) attributes {dimension_semantics = [#tpu.dimension_semantics<parallel>], iteration_bounds = array<i64: 1>, scalar_prefetch = 0 : i64, scratch_operands = 0 : i64, tpu.core_type = #tpu.core_type<tc>, window_params = [{transform_indices = @transform_0, window_bounds = array<i64: 16, 32>}, {pipeline_mode = #tpu.pipeline_mode<synchronous>, transform_indices = @transform_1, window_bounds = array<i64: 32, 64>}, {pipeline_mode = #tpu.pipeline_mode<synchronous>, transform_indices = @transform_2, window_bounds = array<i64: 1, 64>}, {pipeline_mode = #tpu.pipeline_mode<synchronous>, transform_indices = @transform_3, window_bounds = array<i64: 64, 32>}, {pipeline_mode = #tpu.pipeline_mode<synchronous>, transform_indices = @transform_4, window_bounds = array<i64: 1, 32>}, {pipeline_mode = #tpu.pipeline_mode<synchronous>, transform_indices = @transform_5, window_bounds = array<i64: 32, 128>}, {pipeline_mode = #tpu.pipeline_mode<synchronous>, transform_indices = @transform_6, window_bounds = array<i64: 1, 128>}, {transform_indices = @transform_7, window_bounds = array<i64: 16, 128>}]} {
    %c0 = arith.constant 0 : index
    %c0_0 = arith.constant 0 : index
    %0 = vector.load %arg1[%c0, %c0_0] : memref<16x32xf32, #tpu.memory_space<vmem>>, vector<16x32xf32>
    %1 = arith.truncf %0 : vector<16x32xf32> to vector<16x32xbf16>
    %c0_1 = arith.constant 0 : index
    %c0_2 = arith.constant 0 : index
    %2 = vector.load %arg2[%c0_1, %c0_2] : memref<32x64xf32, #tpu.memory_space<vmem>>, vector<32x64xf32>
    %3 = arith.truncf %2 : vector<32x64xf32> to vector<32x64xbf16>
    %cst = arith.constant dense<0.000000e+00> : vector<16x64xf32>
    %4 = tpu.matmul %1, %3, %cst {dimension_numbers = #tpu.dot_dimension_numbers<[1], [0], [0], [1], [0, 0, 1, 1], [], []>} : vector<16x32xbf16>, vector<32x64xbf16>, vector<16x64xf32> -> vector<16x64xf32>
    %c0_3 = arith.constant 0 : index
    %c0_4 = arith.constant 0 : index
    %5 = vector.load %arg3[%c0_3, %c0_4] : memref<1x64xf32, #tpu.memory_space<vmem>>, vector<1x64xf32>
    %6 = vector.broadcast %5 : vector<1x64xf32> to vector<16x64xf32>
    %7 = arith.addf %4, %6 : vector<16x64xf32>
    %cst_5 = arith.constant 0.000000e+00 : f32
    %8 = vector.broadcast %cst_5 : f32 to vector<16x64xf32>
    %9 = arith.maximumf %7, %8 : vector<16x64xf32>
    %10 = arith.truncf %9 : vector<16x64xf32> to vector<16x64xbf16>
    %c0_6 = arith.constant 0 : index
    %c0_7 = arith.constant 0 : index
    %11 = vector.load %arg4[%c0_6, %c0_7] : memref<64x32xf32, #tpu.memory_space<vmem>>, vector<64x32xf32>
    %12 = arith.truncf %11 : vector<64x32xf32> to vector<64x32xbf16>
    %cst_8 = arith.constant dense<0.000000e+00> : vector<16x32xf32>
    %13 = tpu.matmul %10, %12, %cst_8 {dimension_numbers = #tpu.dot_dimension_numbers<[1], [0], [0], [1], [0, 0, 1, 1], [], []>} : vector<16x64xbf16>, vector<64x32xbf16>, vector<16x32xf32> -> vector<16x32xf32>
    %c0_9 = arith.constant 0 : index
    %c0_10 = arith.constant 0 : index
    %14 = vector.load %arg5[%c0_9, %c0_10] : memref<1x32xf32, #tpu.memory_space<vmem>>, vector<1x32xf32>
    %15 = vector.broadcast %14 : vector<1x32xf32> to vector<16x32xf32>
    %16 = arith.addf %13, %15 : vector<16x32xf32>
    %cst_11 = arith.constant 0.000000e+00 : f32
    %17 = vector.broadcast %cst_11 : f32 to vector<16x32xf32>
    %18 = arith.maximumf %16, %17 : vector<16x32xf32>
    %19 = arith.truncf %18 : vector<16x32xf32> to vector<16x32xbf16>
    %c0_12 = arith.constant 0 : index
    %c0_13 = arith.constant 0 : index
    %20 = vector.load %arg6[%c0_12, %c0_13] : memref<32x128xf32, #tpu.memory_space<vmem>>, vector<32x128xf32>
    %21 = arith.truncf %20 : vector<32x128xf32> to vector<32x128xbf16>
    %cst_14 = arith.constant dense<0.000000e+00> : vector<16x128xf32>
    %22 = tpu.matmul %19, %21, %cst_14 {dimension_numbers = #tpu.dot_dimension_numbers<[1], [0], [0], [1], [0, 0, 1, 1], [], []>} : vector<16x32xbf16>, vector<32x128xbf16>, vector<16x128xf32> -> vector<16x128xf32>
    %c0_15 = arith.constant 0 : index
    %c0_16 = arith.constant 0 : index
    %23 = vector.load %arg7[%c0_15, %c0_16] : memref<1x128xf32, #tpu.memory_space<vmem>>, vector<1x128xf32>
    %24 = vector.broadcast %23 : vector<1x128xf32> to vector<16x128xf32>
    %25 = arith.addf %22, %24 : vector<16x128xf32>
    %c0_17 = arith.constant 0 : index
    %c0_18 = arith.constant 0 : index
    %26 = vector.load %arg8[%c0_17, %c0_18] : memref<16x128xf32, #tpu.memory_space<vmem>>, vector<16x128xf32>
    tpu.vector_store %arg8[%c0_17, %c0_18], %25 {strides = array<i32>} : memref<16x128xf32, #tpu.memory_space<vmem>>, vector<16x128xf32>,
    return
  }
  func.func @transform_0(%arg0: i32) -> (i32, i32) {
    %c0_i32 = arith.constant 0 : i32
    %c0_i32_0 = arith.constant 0 : i32
    return %arg0, %c0_i32 : i32, i32
  }
  func.func @transform_1(%arg0: i32) -> (i32, i32) {
    %c0_i32 = arith.constant 0 : i32
    %c0_i32_0 = arith.constant 0 : i32
    %c0_i32_1 = arith.constant 0 : i32
    return %c0_i32, %c0_i32_0 : i32, i32
  }
  func.func @transform_2(%arg0: i32) -> (i32, i32) {
    %c0_i32 = arith.constant 0 : i32
    %c0_i32_0 = arith.constant 0 : i32
    %c0_i32_1 = arith.constant 0 : i32
    return %c0_i32, %c0_i32_0 : i32, i32
  }
  func.func @transform_3(%arg0: i32) -> (i32, i32) {
    %c0_i32 = arith.constant 0 : i32
    %c0_i32_0 = arith.constant 0 : i32
    %c0_i32_1 = arith.constant 0 : i32
    return %c0_i32, %c0_i32_0 : i32, i32
  }
  func.func @transform_4(%arg0: i32) -> (i32, i32) {
    %c0_i32 = arith.constant 0 : i32
    %c0_i32_0 = arith.constant 0 : i32
    %c0_i32_1 = arith.constant 0 : i32
    return %c0_i32, %c0_i32_0 : i32, i32
  }
  func.func @transform_5(%arg0: i32) -> (i32, i32) {
    %c0_i32 = arith.constant 0 : i32
    %c0_i32_0 = arith.constant 0 : i32
    %c0_i32_1 = arith.constant 0 : i32
    return %c0_i32, %c0_i32_0 : i32, i32
  }
  func.func @transform_6(%arg0: i32) -> (i32, i32) {
    %c0_i32 = arith.constant 0 : i32
    %c0_i32_0 = arith.constant 0 : i32
    %c0_i32_1 = arith.constant 0 : i32
    return %c0_i32, %c0_i32_0 : i32, i32
  }
  func.func @transform_7(%arg0: i32) -> (i32, i32) {
    %c0_i32 = arith.constant 0 : i32
    %c0_i32_0 = arith.constant 0 : i32
    return %arg0, %c0_i32 : i32, i32
  }
}

</mosaic_0001>

<bundles_post_ra>
// kernel: tpu_custom_call.1
= control target key start
LH: loop header
LB: loop body
LE: loop exit
PB: predicated region body
PF: predicated region fallthrough
CT: control target
= control target key end

     0   :  { %v306_v3 = vmov 0.0   ;;  %vm307_vm0 = vmmov 0   ;;  %s422_s0 = inlined_call_operand.vmem [shape: f32[16,32], index: 0, kind: input, shape index: {}]   ;;  %s423_s1 = inlined_call_operand.vmem [shape: f32[32,64], index: 1, kind: input, shape index: {}]   ;;  %s424_s2 = inlined_call_operand.vmem [shape: f32[1,64], index: 2, kind: input, shape index: {}]   ;;  %s425_s3 = inlined_call_operand.vmem [shape: f32[64,32], index: 3, kind: input, shape index: {}]   ;;  %s426_s4 = inlined_call_operand.vmem [shape: f32[1,32], index: 4, kind: input, shape index: {}]   ;;  %s427_s5 = inlined_call_operand.vmem [shape: f32[32,128], index: 5, kind: input, shape index: {}]   ;;  %s428_s6 = inlined_call_operand.vmem [shape: f32[1,128], index: 6, kind: input, shape index: {}]   ;;  %s429_s7 = inlined_call_operand.hbm [shape: f32[16,128], index: 7, kind: output, shape index: {}]  }
   0x1   :  { %v33_v0 = vld [vmem:[%s423_s1 + $0x10] sm:$0xff]  ;;  %v34_v1 = vld [vmem:[%s423_s1 + $0x18] sm:$0xff]  ;;  %v31_v2 = vld [vmem:[%s423_s1] sm:$0xff]  ;;  %251 = vmatprep.subr.bf16.mxu0 %v306_v3  ;;  %255 = vmatprep.mubr.msk.bf16.mxu0 %vm307_vm0, %v306_v3 }
   0x2   :  { %v36_v4 = vpack.c.bf16 %v34_v1, %v33_v0  ;;  %v32_v5 = vld [vmem:[%s423_s1 + $0x8] sm:$0xff]  ;;  %259 = vmatprep.subr.bf16.mxu1 %v306_v3  ;;  %v98_v6 = vld [vmem:[%s425_s3 + $0x30] sm:$0xff]  ;;  %v99_v7 = vld [vmem:[%s425_s3 + $0x38] sm:$0xff]  ;;  %267 = vmatprep.mubr.msk.bf16.mxu1 %vm307_vm0, %v306_v3 }
   0x3   :  { %v35_v8 = vpack.c.bf16 %v32_v5, %v31_v2  ;;  %v28_v9 = vld [vmem:[%s422_s0] sm:$0xff]  ;;  %v29_v10 = vld [vmem:[%s422_s0 + $0x8] sm:$0xff]  ;;  %v103_v11 = vpack.c.bf16 %v99_v7, %v98_v6 }
   0x4   :  { %252 = vmatpush3.bf16.msra.mxu0 %v36_v4 }
   0x5   :  { %12 = vsyncpa [#allocation3], 0  ;;  %253 = vmatprep.subr.bf16.mxu0 %v306_v3  ;;  %260 = vmatpush3.bf16.msra.mxu1 %v103_v11  ;;  %v30_v12 = vpack.c.bf16 %v29_v10, %v28_v9  ;;  %vm44_vm1 = vcmask 261120   ;;  %v96_v13 = vld [vmem:[%s425_s3 + $0x20] sm:$0xff]  ;;  %v97_v14 = vld [vmem:[%s425_s3 + $0x28] sm:$0xff]  ;;  %vm111_vm2 = vcmask 523264  }
   0x6   :  { %261 = vmatprep.subr.bf16.mxu1 %v306_v3  ;;  %v102_v15 = vpack.c.bf16 %v97_v14, %v96_v13  ;;  %v94_v16 = vld [vmem:[%s425_s3 + $0x10] sm:$0xff]  ;;  %v95_v17 = vld [vmem:[%s425_s3 + $0x18] sm:$0xff]  ;;  %v92_v19 = vld [vmem:[%s425_s3] sm:$0xff] }
   0x7   :  { %v101_v18 = vpack.c.bf16 %v95_v17, %v94_v16  ;;  %v93_v20 = vld [vmem:[%s425_s3 + $0x8] sm:$0xff]  ;;  %v234_v22 = vld [vmem:[%s424_s2] ss:$0 sm:$0xff]  ;;  %v161_v32 = vld [vmem:[%s427_s5 + $0x10] sm:$0xff] }
   0x8   :  { %254 = vmatpush3.bf16.msra.mxu0 %v35_v8  ;;  %v100_v21 = vpack.c.bf16 %v93_v20, %v92_v19  ;;  %v162_v33 = vld [vmem:[%s427_s5 + $0x18] sm:$0xff]  ;;  %v159_v35 = vld [vmem:[%s427_s5] sm:$0xff]  ;;  %v160_v36 = vld [vmem:[%s427_s5 + $0x8] sm:$0xff]  ;;  %s308_s5 = smov [#allocation2]  }
   0x9   :  { %271 = vmatprep.subr.bf16.mxu0 %v306_v3  ;;  %262 = vmatpush3.bf16.msra.mxu1 %v102_v15  ;;  %v164_v34 = vpack.c.bf16 %v162_v33, %v161_v32  ;;  %v163_v37 = vpack.c.bf16 %v160_v36, %v159_v35  ;;  %v236_v38 = vld [vmem:[%s426_s4] ss:$0 sm:$0xff]  ;;  %s223_s15 = sshll.u32 %s308_s5, 4  ;;  %s224_s15 = int_to_ptr.vmem [resolvable:$true] %s223_s15 }
   0xa   :  { %263 = vmatprep.subr.bf16.mxu1 %v306_v3  ;;  %v238_v48 = vld [vmem:[%s428_s6] ss:$0 sm:$0xff]  ;;  %s284_s4 = scalar_lea.vmem %s224_s15, 256  ;;  %p289_p1 = scmp.lt.s32.totalorder %s224_s15, %s224_s15 }
   0xb   :  { %256 = vmatmul.mubr.msk.bf16.vlgmr.msra.gmra.mxu0 %vm44_vm1, %v30_v12  ;;  %p285_p0 = scmp.ne.s32.totalorder %s224_s15, %s284_s4  ;;  %p290_p2 = scmp.lt.s32.totalorder %s284_s4, %s284_s4 }
   0xc   :  { %275 = vmatprep.mubr.msk.bf16.mxu0 %vm307_vm0, %v306_v3  ;;  %272 = vmatpush3.bf16.msra.mxu0 %v164_v34 }
   0xd   :  { %264 = vmatpush3.bf16.msra.mxu1 %v101_v18  ;;  %273 = vmatprep.subr.bf16.mxu0 %v306_v3  ;;  %p291_p3 = por %p290_p2, %p289_p1 }
   0xe   :  { %265 = vmatprep.subr.bf16.mxu1 %v306_v3 }
   0xf   :  { %p292_p4 = pnand %p291_p3, %p285_p0 }
  0x10   :  { %274 = vmatpush3.bf16.msra.mxu0 %v163_v37 }
  0x11   :  { %266 = vmatpush3.bf16.msra.mxu1 %v100_v21 }
  0xcb   :  { %v82_v23 = vpop.f32.mrf.mxu0 }
  0xcc   :  { %v83_v25 = vadd.f32 %v234_v22, %v82_v23 }
  0xcd   :  { %v257_v24 = vpop.f32.mrf.mxu0 }
  0xce   :  { %v89_v29 = vmax.f32 %v83_v25, 0.0 }
  0xcf   :  { %v85_v26 = vpop.f32.mrf.mxu0 }
  0xd0   :  { %v86_v27 = vadd.f32 %v234_v22, %v85_v26 }
  0xd1   :  { %v258_v28 = vpop.f32.mrf.mxu0 }
  0xd2   :  { %v90_v30 = vmax.f32 %v86_v27, 0.0 }
  0xd4   :  { %v91_v31 = vpack.c.bf16 %v90_v30, %v89_v29 }
  0xd6   :  { %268 = vmatmul.mubr.msk.bf16.vlgmr.msra.gmra.mxu1 %vm111_vm2, %v91_v31 }
 0x196   :  { %v149_v39 = vpop.f32.mrf.mxu1 }
 0x197   :  { %v150_v41 = vadd.f32 %v236_v38, %v149_v39 }
 0x198   :  { %v269_v40 = vpop.f32.mrf.mxu1 }
 0x199   :  { %v156_v45 = vmax.f32 %v150_v41, 0.0 }
 0x19a   :  { %v152_v42 = vpop.f32.mrf.mxu1 }
 0x19b   :  { %v153_v43 = vadd.f32 %v236_v38, %v152_v42 }
 0x19c   :  { %v270_v44 = vpop.f32.mrf.mxu1 }
 0x19d   :  { %v157_v46 = vmax.f32 %v153_v43, 0.0 }
 0x19f   :  { %v158_v47 = vpack.c.bf16 %v157_v46, %v156_v45 }
 0x1a1   :  { %276 = vmatmul.mubr.msk.bf16.vlgmr.msra.gmra.mxu0 %vm44_vm1, %v158_v47 }
 0x261   :  { %v209_v49 = vpop.f32.mrf.mxu0 }
 0x262   :  { %v210_v50 = vadd.f32 %v238_v48, %v209_v49 }
 0x263   :  { %v277_v51 = vpop.f32.mrf.mxu0 }
 0x264   :  { %216 = vst [vmem:[#allocation2] sm:$0xff] %v210_v50 }
 0x265   :  { %v212_v52 = vpop.f32.mrf.mxu0 }
 0x266   :  { %v213_v53 = vadd.f32 %v238_v48, %v212_v52 }
 0x267   :  { %v278_v54 = vpop.f32.mrf.mxu0 }
 0x268   :  { %217 = vst [vmem:[#allocation2 + $0x8] sm:$0xff] %v213_v53 }
 0x269   :  { %295 = shalt.err (!%p292_p4)
}
 0x26a   :  { %s309_s16 = smov 128   ;;  %s310_s6 = smov 8  }
 0x26b   :  { %229 = dma.vmem_to_hbm [thread:$0]  %s224_s15, 256, %s429_s7, [#allocation3], %s309_s16, %s309_s16, %s310_s6  }
 0x26c   :  { %304 = dma.done.wait [#allocation3], 256  }
 0x26d   :  { %305 = vsyncadd [#allocation3], 4294967040 }
 0x26e   :  { %233 = vsyncpa [#allocation3], 1 }

</bundles_post_ra>
